<compile_context>
chip_gen: v6e
topology: v6e:2x2x1
jax: 0.10.0
libtpu: 0.0.40
codegen_flags: <defaults>
</compile_context>

<pallas_src>
import functools

import jax
import jax.numpy as jnp
from jax import lax
from jax.experimental import pallas as pl
from jax.experimental.pallas import tpu as pltpu


def _dpcl_kernel(xg_ref, xc_ref, y_ref, py_ref, o_ref,
                 proxy_ref, m_ref, l_ref, smask_ref, smadc_ref,
                 *, k, inv_temp, eps, mm_dtype):
    """Grid = (nP, nB); bi (axis 1) is the reduction axis over contrast rows.

    xg_ref:    (TP*k, D) f32   rows of x belonging to this tile's proxies
    xc_ref:    (TB,   D) f32   contrastive rows (current B chunk)
    y_ref:     (TB,   1) i32   labels of the contrastive rows
    py_ref:    (1,   TP) i32   labels of this tile's proxies
    o_ref:     (1,   TP) f32   mean_log_prob_pos per proxy (written on last chunk)
    proxy_ref: (TP,   D) mm    normalized group means, pre-scaled by 1/T
    m/l/smask/smadc: (1, TP) f32  online softmax + masked-sum running stats
    """
    bi = pl.program_id(1)
    tp = m_ref.shape[1]

    # ---- once per P tile: build proxies + reset running stats --------------
    @pl.when(bi == 0)
    def _():
        def _norm_rows(j):
            # strided sublane read: rows {j, j+k, j+2k, ...} = member j of each group
            rows = xg_ref[pl.ds(j, tp, stride=k), :]
            inv = lax.rsqrt(jnp.maximum(
                jnp.sum(rows * rows, axis=1, keepdims=True), 1e-24))
            return rows * inv                       # == F.normalize(row, dim=-1)

        acc = _norm_rows(0)
        for j in range(1, k):                       # k is a small static int -> unrolled
            acc = acc + _norm_rows(j)
        # group mean folded with the 1/temperature logit scale (applied to the
        # small (TP, D) operand instead of the (TB, TP) matmul result)
        proxy_ref[...] = (acc * (inv_temp / k)).astype(mm_dtype)

        zeros = jnp.zeros(m_ref.shape, dtype=jnp.float32)
        m_ref[...] = jnp.full(m_ref.shape, -jnp.inf, dtype=jnp.float32)
        l_ref[...] = zeros
        smask_ref[...] = zeros
        smadc_ref[...] = zeros

    # ---- per B chunk: normalize, MXU matmul, online stats -------------------
    xc = xc_ref[...]
    inv = lax.rsqrt(jnp.maximum(jnp.sum(xc * xc, axis=1, keepdims=True), 1e-24))
    xn = (xc * inv).astype(mm_dtype)                               # (TB, D)

    # adc[b, p] = <xn_b, proxy_p> / T  (proxy already carries the 1/T scale).
    # Large operand (xn) is the natural (M, K) LHS; only the small proxy
    # operand sits in trans-B position.
    adc = lax.dot_general(xn, proxy_ref[...],
                          dimension_numbers=(((1,), (1,)), ((), ())),
                          preferred_element_type=jnp.float32)      # (TB, TP) f32

    mask = (y_ref[...] == py_ref[...]).astype(jnp.float32)         # (TB, TP)

    m_prev = m_ref[...]
    m_new = jnp.maximum(m_prev, jnp.max(adc, axis=0, keepdims=True))   # (1, TP)
    l_ref[...] = l_ref[...] * jnp.exp(m_prev - m_new) + \
        jnp.sum(jnp.exp(adc - m_new), axis=0, keepdims=True)
    m_ref[...] = m_new
    smask_ref[...] = smask_ref[...] + jnp.sum(mask, axis=0, keepdims=True)
    smadc_ref[...] = smadc_ref[...] + jnp.sum(mask * adc, axis=0, keepdims=True)

    # ---- after the last B chunk: fold the masked log-softmax ---------------
    @pl.when(bi == pl.num_programs(1) - 1)
    def _():
        lse = m_ref[...] + jnp.log(l_ref[...])                     # (1, TP)
        num = smadc_ref[...] - lse * smask_ref[...]                # = sum(mask*log_prob)
        o_ref[...] = num / (smask_ref[...] + eps)                  # mean_log_prob_pos


def _largest_divisor_tile(total, target, unit):
    """Largest multiple of `unit` that divides `total` and is <= target; else `total`."""
    if total <= target:
        return total
    t = (target // unit) * unit
    while t >= unit:
        if total % t == 0:
            return t
        t -= unit
    return total


def domain_proxy_contrast_loss(x, y, *, k, temperature, eps=1e-6,
                               matmul_dtype=jnp.bfloat16,
                               proxy_tile=None, batch_tile=None):
    """x: (B, D) float, y: (B,) int labels. Returns scalar float32 loss."""
    B, D = x.shape
    assert B % k == 0, "batch must be divisible by hparams['k']"
    P = B // k

    x = x.astype(jnp.float32)
    y_col = y.astype(jnp.int32).reshape(B, 1)                       # (B, 1)
    py_row = y.astype(jnp.int32).reshape(P, k)[:, 0].reshape(1, P)  # (1, P)

    # Tile sizes: proxy tile maps to the lane axis of the output (multiple of
    # 128 or full P); batch chunk maps to sublanes (multiple of 8 or full B),
    # sized so a single f32 (TB, D) chunk stays around <= 4 MiB.
    tp_target = 256 if D <= 2048 else 128
    TP = proxy_tile or _largest_divisor_tile(P, tp_target, 128)
    tb_target = max(8, min(1024, (4 << 20) // (4 * D)))
    TB = batch_tile or _largest_divisor_tile(B, tb_target, 8)
    nP, nB = P // TP, B // TB

    kernel = functools.partial(
        _dpcl_kernel, k=int(k), inv_temp=1.0 / float(temperature),
        eps=float(eps), mm_dtype=matmul_dtype)

    grid_spec = pltpu.PrefetchScalarGridSpec(
        num_scalar_prefetch=0,
        grid=(nP, nB),                                  # reduction axis (B) last
        in_specs=[
            pl.BlockSpec((TP * k, D), lambda pi, bi: (pi, 0)),   # group rows (proxies)
            pl.BlockSpec((TB, D),     lambda pi, bi: (bi, 0)),   # contrast rows
            pl.BlockSpec((TB, 1),     lambda pi, bi: (bi, 0)),   # y labels (column)
            pl.BlockSpec((1, TP),     lambda pi, bi: (0, pi)),   # proxy labels (row)
        ],
        out_specs=pl.BlockSpec((1, TP), lambda pi, bi: (0, pi)),  # lane-dense output
        scratch_shapes=[
            pltpu.VMEM((TP, D), matmul_dtype),   # pre-scaled normalized proxies
            pltpu.VMEM((1, TP), jnp.float32),    # running max
            pltpu.VMEM((1, TP), jnp.float32),    # running sum(exp)
            pltpu.VMEM((1, TP), jnp.float32),    # sum(mask)
            pltpu.VMEM((1, TP), jnp.float32),    # sum(mask * adc)
        ],
    )

    mlpp = pl.pallas_call(
        kernel,
        out_shape=jax.ShapeDtypeStruct((1, P), jnp.float32),
        grid_spec=grid_spec,
        compiler_params=pltpu.CompilerParams(
            dimension_semantics=("parallel", "arbitrary"),   # P shards across TCs
            vmem_limit_bytes=40 * 1024 * 1024),              # safe headroom on v7x's 64 MiB
    )(x, x, y_col, py_row)

    # Tiny epilogue over P values: negate + mean over proxies.
    return -jnp.mean(mlpp)


def _reference(x, y, *, k, temperature, eps=1e-6):
    """Pure-JAX reference mirroring the PyTorch forward."""
    B = x.shape[0]
    xn = x / jnp.maximum(jnp.linalg.norm(x, axis=1, keepdims=True), 1e-12)
    proxy = xn.reshape(B // k, k, -1).mean(1)
    proxy_y = y.reshape(B // k, k)[:, 0]
    mask = (proxy_y[:, None] == y[None, :]).astype(jnp.float32)
    adc = jnp.matmul(proxy, xn.T, precision=lax.Precision.HIGHEST) / temperature
    logits = adc - jnp.max(adc, axis=1, keepdims=True)
    log_prob = logits - jnp.log(jnp.sum(jnp.exp(logits), axis=1, keepdims=True))
    mlpp = jnp.sum(mask * log_prob, axis=1) / (jnp.sum(mask, axis=1) + eps)
    return jnp.mean(-mlpp)


if __name__ == "__main__":
    # hparams
    K = 2
    TEMPERATURE = 0.07

    # small deterministic inputs: batch=8, hidden=32
    B, D = 8, 32
    key = jax.random.PRNGKey(0)
    kx, ky = jax.random.split(key)
    x = jax.random.normal(kx, (B, D), dtype=jnp.float32)
    y = jax.random.randint(ky, (B,), 0, 3, dtype=jnp.int32)

    ref = jax.block_until_ready(_reference(x, y, k=K, temperature=TEMPERATURE))

    # High-precision path (f32 MXU operands) against the pure-JAX reference.
    loss_f32 = jax.block_until_ready(domain_proxy_contrast_loss(
        x, y, k=K, temperature=TEMPERATURE, matmul_dtype=jnp.float32))
    assert jnp.allclose(loss_f32, ref, rtol=3e-2, atol=3e-2), (loss_f32, ref)

    # Default fast path: bf16 MXU operands, f32 accumulation + f32 softmax math.
    loss = jax.block_until_ready(domain_proxy_contrast_loss(
        x, y, k=K, temperature=TEMPERATURE))
    assert jnp.allclose(loss, ref, rtol=8e-2, atol=8e-2), (loss, ref)

    print("KERNEL_OK")
</pallas_src>

<mosaic_0001>
module attributes {stable_mosaic.version = 11 : i64} {
  func.func @_dpcl_kernel(%arg0: i32, %arg1: i32, %arg2: memref<8x32xf32, #tpu.memory_space<vmem>>, %arg3: memref<8x32xf32, #tpu.memory_space<vmem>>, %arg4: memref<8x1xi32, #tpu.memory_space<vmem>>, %arg5: memref<1x4xi32, #tpu.memory_space<vmem>>, %arg6: memref<1x4xf32, #tpu.memory_space<vmem>>, %arg7: memref<4x32xf32, #tpu.memory_space<vmem>>, %arg8: memref<1x4xf32, #tpu.memory_space<vmem>>, %arg9: memref<1x4xf32, #tpu.memory_space<vmem>>, %arg10: memref<1x4xf32, #tpu.memory_space<vmem>>, %arg11: memref<1x4xf32, #tpu.memory_space<vmem>>) attributes {dimension_semantics = [#tpu.dimension_semantics<parallel>, #tpu.dimension_semantics<arbitrary>], iteration_bounds = array<i64: 1, 1>, scalar_prefetch = 0 : i64, scratch_operands = 5 : i64, tpu.core_type = #tpu.core_type<tc>, window_params = [{transform_indices = @transform_0, window_bounds = array<i64: 8, 32>}, {transform_indices = @transform_1, window_bounds = array<i64: 8, 32>}, {transform_indices = @transform_2, window_bounds = array<i64: 8, 1>}, {transform_indices = @transform_3, window_bounds = array<i64: 1, 4>}, {transform_indices = @transform_4, window_bounds = array<i64: 1, 4>}]} {
    %c0_i32 = arith.constant 0 : i32
    %0 = arith.cmpi eq, %arg1, %c0_i32 : i32
    %1 = arith.extui %0 : i1 to i32
    %c0_i32_0 = arith.constant 0 : i32
    %2 = arith.cmpi ne, %1, %c0_i32_0 : i32
    scf.if %2 {
      %c0_32 = arith.constant 0 : index
      %c0_33 = arith.constant 0 : index
      %51 = tpu.strided_load %arg2[%c0_32, %c0_33] {strides = array<i32: 2, 1>} : memref<8x32xf32, #tpu.memory_space<vmem>>, vector<4x32xf32>
      %52 = arith.mulf %51, %51 : vector<4x32xf32>
      %cst_34 = arith.constant dense<0.000000e+00> : vector<4xf32>
      %53 = vector.multi_reduction <add>, %52, %cst_34 [1] : vector<4x32xf32> to vector<4xf32>
      %54 = vector.shape_cast %53 : vector<4xf32> to vector<4x1xf32>
      %cst_35 = arith.constant 1.000000e-24 : f32
      %55 = vector.broadcast %cst_35 : f32 to vector<4x1xf32>
      %56 = arith.maximumf %54, %55 : vector<4x1xf32>
      %57 = math.rsqrt %56 : vector<4x1xf32>
      %58 = vector.broadcast %57 : vector<4x1xf32> to vector<4x32xf32>
      %59 = arith.mulf %51, %58 : vector<4x32xf32>
      %c1 = arith.constant 1 : index
      %c0_36 = arith.constant 0 : index
      %60 = tpu.strided_load %arg2[%c1, %c0_36] {strides = array<i32: 2, 1>} : memref<8x32xf32, #tpu.memory_space<vmem>>, vector<4x32xf32>
      %61 = arith.mulf %60, %60 : vector<4x32xf32>
      %cst_37 = arith.constant dense<0.000000e+00> : vector<4xf32>
      %62 = vector.multi_reduction <add>, %61, %cst_37 [1] : vector<4x32xf32> to vector<4xf32>
      %63 = vector.shape_cast %62 : vector<4xf32> to vector<4x1xf32>
      %cst_38 = arith.constant 1.000000e-24 : f32
      %64 = vector.broadcast %cst_38 : f32 to vector<4x1xf32>
      %65 = arith.maximumf %63, %64 : vector<4x1xf32>
      %66 = math.rsqrt %65 : vector<4x1xf32>
      %67 = vector.broadcast %66 : vector<4x1xf32> to vector<4x32xf32>
      %68 = arith.mulf %60, %67 : vector<4x32xf32>
      %69 = arith.addf %59, %68 : vector<4x32xf32>
      %cst_39 = arith.constant 7.14285707 : f32
      %70 = vector.broadcast %cst_39 : f32 to vector<4x32xf32>
      %71 = arith.mulf %69, %70 : vector<4x32xf32>
      %c0_40 = arith.constant 0 : index
      %c0_41 = arith.constant 0 : index
      %72 = vector.load %arg7[%c0_40, %c0_41] : memref<4x32xf32, #tpu.memory_space<vmem>>, vector<4x32xf32>
      tpu.vector_store %arg7[%c0_40, %c0_41], %71 {strides = array<i32>} : memref<4x32xf32, #tpu.memory_space<vmem>>, vector<4x32xf32>,
      %cst_42 = arith.constant 0.000000e+00 : f32
      %73 = vector.broadcast %cst_42 : f32 to vector<1x4xf32>
      %cst_43 = arith.constant 0xFF800000 : f32
      %74 = vector.broadcast %cst_43 : f32 to vector<1x4xf32>
      %c0_44 = arith.constant 0 : index
      %c0_45 = arith.constant 0 : index
      %75 = vector.load %arg8[%c0_44, %c0_45] : memref<1x4xf32, #tpu.memory_space<vmem>>, vector<1x4xf32>
      tpu.vector_store %arg8[%c0_44, %c0_45], %74 {strides = array<i32>} : memref<1x4xf32, #tpu.memory_space<vmem>>, vector<1x4xf32>,
      %c0_46 = arith.constant 0 : index
      %c0_47 = arith.constant 0 : index
      %76 = vector.load %arg9[%c0_46, %c0_47] : memref<1x4xf32, #tpu.memory_space<vmem>>, vector<1x4xf32>
      tpu.vector_store %arg9[%c0_46, %c0_47], %73 {strides = array<i32>} : memref<1x4xf32, #tpu.memory_space<vmem>>, vector<1x4xf32>,
      %c0_48 = arith.constant 0 : index
      %c0_49 = arith.constant 0 : index
      %77 = vector.load %arg10[%c0_48, %c0_49] : memref<1x4xf32, #tpu.memory_space<vmem>>, vector<1x4xf32>
      tpu.vector_store %arg10[%c0_48, %c0_49], %73 {strides = array<i32>} : memref<1x4xf32, #tpu.memory_space<vmem>>, vector<1x4xf32>,
      %c0_50 = arith.constant 0 : index
      %c0_51 = arith.constant 0 : index
      %78 = vector.load %arg11[%c0_50, %c0_51] : memref<1x4xf32, #tpu.memory_space<vmem>>, vector<1x4xf32>
      tpu.vector_store %arg11[%c0_50, %c0_51], %73 {strides = array<i32>} : memref<1x4xf32, #tpu.memory_space<vmem>>, vector<1x4xf32>,
    } else {
    }
    %c0 = arith.constant 0 : index
    %c0_1 = arith.constant 0 : index
    %3 = vector.load %arg3[%c0, %c0_1] : memref<8x32xf32, #tpu.memory_space<vmem>>, vector<8x32xf32>
    %4 = arith.mulf %3, %3 : vector<8x32xf32>
    %cst = arith.constant dense<0.000000e+00> : vector<8xf32>
    %5 = vector.multi_reduction <add>, %4, %cst [1] : vector<8x32xf32> to vector<8xf32>
    %6 = vector.shape_cast %5 : vector<8xf32> to vector<8x1xf32>
    %cst_2 = arith.constant 1.000000e-24 : f32
    %7 = vector.broadcast %cst_2 : f32 to vector<8x1xf32>
    %8 = arith.maximumf %6, %7 : vector<8x1xf32>
    %9 = math.rsqrt %8 : vector<8x1xf32>
    %10 = vector.broadcast %9 : vector<8x1xf32> to vector<8x32xf32>
    %11 = arith.mulf %3, %10 : vector<8x32xf32>
    %c0_3 = arith.constant 0 : index
    %c0_4 = arith.constant 0 : index
    %12 = vector.load %arg7[%c0_3, %c0_4] : memref<4x32xf32, #tpu.memory_space<vmem>>, vector<4x32xf32>
    %cst_5 = arith.constant dense<0.000000e+00> : vector<8x4xf32>
    %13 = tpu.matmul %11, %12, %cst_5 {dimension_numbers = #tpu.dot_dimension_numbers<[1], [1], [0], [0], [0, 0, 1, 0], [], []>} : vector<8x32xf32>, vector<4x32xf32>, vector<8x4xf32> -> vector<8x4xf32>
    %c0_6 = arith.constant 0 : index
    %c0_7 = arith.constant 0 : index
    %14 = vector.load %arg4[%c0_6, %c0_7] : memref<8x1xi32, #tpu.memory_space<vmem>>, vector<8x1xi32>
    %c0_8 = arith.constant 0 : index
    %c0_9 = arith.constant 0 : index
    %15 = vector.load %arg5[%c0_8, %c0_9] : memref<1x4xi32, #tpu.memory_space<vmem>>, vector<1x4xi32>
    %16 = vector.broadcast %14 : vector<8x1xi32> to vector<8x4xi32>
    %17 = vector.broadcast %15 : vector<1x4xi32> to vector<8x4xi32>
    %18 = arith.cmpi eq, %16, %17 : vector<8x4xi32>
    %19 = arith.extui %18 : vector<8x4xi1> to vector<8x4xi32>
    %20 = arith.sitofp %19 : vector<8x4xi32> to vector<8x4xf32>
    %c0_10 = arith.constant 0 : index
    %c0_11 = arith.constant 0 : index
    %21 = vector.load %arg8[%c0_10, %c0_11] : memref<1x4xf32, #tpu.memory_space<vmem>>, vector<1x4xf32>
    %cst_12 = arith.constant dense<0xFF800000> : vector<4xf32>
    %22 = vector.multi_reduction <maximumf>, %13, %cst_12 [0] : vector<8x4xf32> to vector<4xf32>
    %23 = vector.shape_cast %22 : vector<4xf32> to vector<1x4xf32>
    %24 = arith.maximumf %21, %23 : vector<1x4xf32>
    %c0_13 = arith.constant 0 : index
    %c0_14 = arith.constant 0 : index
    %25 = vector.load %arg9[%c0_13, %c0_14] : memref<1x4xf32, #tpu.memory_space<vmem>>, vector<1x4xf32>
    %26 = arith.subf %21, %24 : vector<1x4xf32>
    %27 = math.exp %26 : vector<1x4xf32>
    %28 = arith.mulf %25, %27 : vector<1x4xf32>
    %29 = vector.broadcast %24 : vector<1x4xf32> to vector<8x4xf32>
    %30 = arith.subf %13, %29 : vector<8x4xf32>
    %31 = math.exp %30 : vector<8x4xf32>
    %cst_15 = arith.constant dense<0.000000e+00> : vector<4xf32>
    %32 = vector.multi_reduction <add>, %31, %cst_15 [0] : vector<8x4xf32> to vector<4xf32>
    %33 = vector.shape_cast %32 : vector<4xf32> to vector<1x4xf32>
    %34 = arith.addf %28, %33 : vector<1x4xf32>
    %c0_16 = arith.constant 0 : index
    %c0_17 = arith.constant 0 : index
    %35 = vector.load %arg9[%c0_16, %c0_17] : memref<1x4xf32, #tpu.memory_space<vmem>>, vector<1x4xf32>
    tpu.vector_store %arg9[%c0_16, %c0_17], %34 {strides = array<i32>} : memref<1x4xf32, #tpu.memory_space<vmem>>, vector<1x4xf32>,
    %c0_18 = arith.constant 0 : index
    %c0_19 = arith.constant 0 : index
    %36 = vector.load %arg8[%c0_18, %c0_19] : memref<1x4xf32, #tpu.memory_space<vmem>>, vector<1x4xf32>
    tpu.vector_store %arg8[%c0_18, %c0_19], %24 {strides = array<i32>} : memref<1x4xf32, #tpu.memory_space<vmem>>, vector<1x4xf32>,
    %c0_20 = arith.constant 0 : index
    %c0_21 = arith.constant 0 : index
    %37 = vector.load %arg10[%c0_20, %c0_21] : memref<1x4xf32, #tpu.memory_space<vmem>>, vector<1x4xf32>
    %cst_22 = arith.constant dense<0.000000e+00> : vector<4xf32>
    %38 = vector.multi_reduction <add>, %20, %cst_22 [0] : vector<8x4xf32> to vector<4xf32>
    %39 = vector.shape_cast %38 : vector<4xf32> to vector<1x4xf32>
    %40 = arith.addf %37, %39 : vector<1x4xf32>
    %c0_23 = arith.constant 0 : index
    %c0_24 = arith.constant 0 : index
    %41 = vector.load %arg10[%c0_23, %c0_24] : memref<1x4xf32, #tpu.memory_space<vmem>>, vector<1x4xf32>
    tpu.vector_store %arg10[%c0_23, %c0_24], %40 {strides = array<i32>} : memref<1x4xf32, #tpu.memory_space<vmem>>, vector<1x4xf32>,
    %c0_25 = arith.constant 0 : index
    %c0_26 = arith.constant 0 : index
    %42 = vector.load %arg11[%c0_25, %c0_26] : memref<1x4xf32, #tpu.memory_space<vmem>>, vector<1x4xf32>
    %43 = arith.mulf %20, %13 : vector<8x4xf32>
    %cst_27 = arith.constant dense<0.000000e+00> : vector<4xf32>
    %44 = vector.multi_reduction <add>, %43, %cst_27 [0] : vector<8x4xf32> to vector<4xf32>
    %45 = vector.shape_cast %44 : vector<4xf32> to vector<1x4xf32>
    %46 = arith.addf %42, %45 : vector<1x4xf32>
    %c0_28 = arith.constant 0 : index
    %c0_29 = arith.constant 0 : index
    %47 = vector.load %arg11[%c0_28, %c0_29] : memref<1x4xf32, #tpu.memory_space<vmem>>, vector<1x4xf32>
    tpu.vector_store %arg11[%c0_28, %c0_29], %46 {strides = array<i32>} : memref<1x4xf32, #tpu.memory_space<vmem>>, vector<1x4xf32>,
    %c0_i32_30 = arith.constant 0 : i32
    %48 = arith.cmpi eq, %arg1, %c0_i32_30 : i32
    %49 = arith.extui %48 : i1 to i32
    %c0_i32_31 = arith.constant 0 : i32
    %50 = arith.cmpi ne, %49, %c0_i32_31 : i32
    scf.if %50 {
      %c0_32 = arith.constant 0 : index
      %c0_33 = arith.constant 0 : index
      %51 = vector.load %arg8[%c0_32, %c0_33] : memref<1x4xf32, #tpu.memory_space<vmem>>, vector<1x4xf32>
      %c0_34 = arith.constant 0 : index
      %c0_35 = arith.constant 0 : index
      %52 = vector.load %arg9[%c0_34, %c0_35] : memref<1x4xf32, #tpu.memory_space<vmem>>, vector<1x4xf32>
      %53 = math.log %52 : vector<1x4xf32>
      %54 = arith.addf %51, %53 : vector<1x4xf32>
      %c0_36 = arith.constant 0 : index
      %c0_37 = arith.constant 0 : index
      %55 = vector.load %arg11[%c0_36, %c0_37] : memref<1x4xf32, #tpu.memory_space<vmem>>, vector<1x4xf32>
      %c0_38 = arith.constant 0 : index
      %c0_39 = arith.constant 0 : index
      %56 = vector.load %arg10[%c0_38, %c0_39] : memref<1x4xf32, #tpu.memory_space<vmem>>, vector<1x4xf32>
      %57 = arith.mulf %54, %56 : vector<1x4xf32>
      %58 = arith.subf %55, %57 : vector<1x4xf32>
      %c0_40 = arith.constant 0 : index
      %c0_41 = arith.constant 0 : index
      %59 = vector.load %arg10[%c0_40, %c0_41] : memref<1x4xf32, #tpu.memory_space<vmem>>, vector<1x4xf32>
      %cst_42 = arith.constant 9.99999997E-7 : f32
      %60 = vector.broadcast %cst_42 : f32 to vector<1x4xf32>
      %61 = arith.addf %59, %60 : vector<1x4xf32>
      %62 = arith.divf %58, %61 : vector<1x4xf32>
      %c0_43 = arith.constant 0 : index
      %c0_44 = arith.constant 0 : index
      %63 = vector.load %arg6[%c0_43, %c0_44] : memref<1x4xf32, #tpu.memory_space<vmem>>, vector<1x4xf32>
      tpu.vector_store %arg6[%c0_43, %c0_44], %62 {strides = array<i32>} : memref<1x4xf32, #tpu.memory_space<vmem>>, vector<1x4xf32>,
    } else {
    }
    return
  }
  func.func @transform_0(%arg0: i32, %arg1: i32) -> (i32, i32) {
    %c0_i32 = arith.constant 0 : i32
    %c0_i32_0 = arith.constant 0 : i32
    return %arg0, %c0_i32 : i32, i32
  }
  func.func @transform_1(%arg0: i32, %arg1: i32) -> (i32, i32) {
    %c0_i32 = arith.constant 0 : i32
    %c0_i32_0 = arith.constant 0 : i32
    return %arg1, %c0_i32 : i32, i32
  }
  func.func @transform_2(%arg0: i32, %arg1: i32) -> (i32, i32) {
    %c0_i32 = arith.constant 0 : i32
    %c0_i32_0 = arith.constant 0 : i32
    return %arg1, %c0_i32 : i32, i32
  }
  func.func @transform_3(%arg0: i32, %arg1: i32) -> (i32, i32) {
    %c0_i32 = arith.constant 0 : i32
    %c0_i32_0 = arith.constant 0 : i32
    return %c0_i32, %arg0 : i32, i32
  }
  func.func @transform_4(%arg0: i32, %arg1: i32) -> (i32, i32) {
    %c0_i32 = arith.constant 0 : i32
    %c0_i32_0 = arith.constant 0 : i32
    return %c0_i32, %arg0 : i32, i32
  }
}

</mosaic_0001>

<bundles_post_ra>
// kernel: tpu_custom_call.1
= control target key start
LH: loop header
LB: loop body
LE: loop exit
PB: predicated region body
PF: predicated region fallthrough
CT: control target
= control target key end

     0   :  { %9 = vsyncpa [#allocation8], 0  ;;  %s391_s0 = inlined_call_operand.vmem [shape: f32[8,32], index: 0, kind: input, shape index: {}]   ;;  %s392_s1 = inlined_call_operand.hbm [shape: f32[8,32], index: 1, kind: input, shape index: {}]   ;;  %s393_s2 = inlined_call_operand.vmem [shape: s32[8,1], index: 2, kind: input, shape index: {}]   ;;  %s394_s3 = inlined_call_operand.vmem [shape: s32[1,4], index: 3, kind: input, shape index: {}]   ;;  %s395_s4 = inlined_call_operand.hbm [shape: f32[1,4], index: 4, kind: output, shape index: {}]  }
   0x1   :  { %10 = vsyncpa [#allocation9], 0  ;;  %s323_s15 = smov [#allocation7]  }
   0x2   :  { %s19_s16 = sshll.u32 %s323_s15, 4  ;;  %s20_s16 = int_to_ptr.vmem [resolvable:$true] %s19_s16 }
   0x3   :  { %s287_s17 = scalar_lea.vmem %s20_s16, 128  ;;  %p292_p1 = scmp.lt.s32.totalorder %s20_s16, %s20_s16 }
   0x4   :  { %p288_p0 = scmp.ne.s32.totalorder %s20_s16, %s287_s17  ;;  %p293_p2 = scmp.lt.s32.totalorder %s287_s17, %s287_s17 }
   0x6   :  { %p294_p3 = por %p293_p2, %p292_p1 }
   0x8   :  { %p295_p4 = pnand %p294_p3, %p288_p0 }
   0xa   :  { %298 = shalt.err (!%p295_p4)
}
   0xb   :  { %22 = dma.hbm_to_vmem [thread:$0]  %s392_s1, 128, %s20_s16, [#allocation8]  }
   0xc   :  { %319 = dma.done.wait [#allocation8], 128  }
   0xd   :  { %320 = vsyncadd [#allocation8], 4294967168  ;;  %vm36_vm0 = vcmask 257024   ;;  %v34_v0 = vld [vmem:[%s391_s0] ss:$2 sm:$0xf]  ;;  %v174_v47 = vlaneseq }
   0xe   :  { %v245_v1 = vld [vmem:[%s391_s0 + $0x1] ss:$2 sm:$0xf]  ;;  %v35_v2 = vmul.f32 %v34_v0, %v34_v0  ;;  %v60_v4 = vld [vmem:[#allocation7] sm:$0xff]  ;;  %vm62_vm1 = vcmask 261120   ;;  %vm55_vm2 = vcmask 24576  }
   0xf   :  { %v45_v3 = vmul.f32 %v245_v1, %v245_v1  ;;  %v61_v5 = vmul.f32 %v60_v4, %v60_v4  ;;  %v324_v9 = vmov 0.0   ;;  %vm325_vm3 = vmmov 0   ;;  %v146_v10 = vld [vmem:[%s393_s2] sm:$0xff] }
  0x10   :  { %v37_v6 = vsel %vm36_vm0, %v35_v2, 0.0  ;;  %57 = vst.msk [vmem:[#allocation4] sm:$0x1] %vm55_vm2, %v324_v9  ;;  %58 = vst.msk [vmem:[#allocation5] sm:$0x1] %vm55_vm2, %v324_v9  ;;  %252 = vmatprep.subr.mxu0 %v324_v9  ;;  %254 = vmatprep.mubr.msk.f32.mxu0 %vm325_vm3, %v324_v9  ;;  %v326_v11 = vmov 0  }
  0x11   :  { %38 = vadd.xlane.f32.xlu0 %v37_v6  ;;  %v63_v7 = vsel %vm62_vm1, %v61_v5, 0.0  ;;  %v46_v8 = vsel %vm36_vm0, %v45_v3, 0.0  ;;  %59 = vst.msk [vmem:[#allocation6] sm:$0x1] %vm55_vm2, %v324_v9  ;;  %263 = vset.pattern.permute.xlu1 %v326_v11  ;;  %v327_v12 = vmov -inf   ;;  %vm159_vm5 = vcmask 31744  }
  0x12   :  { %64 = vadd.xlane.f32.xlu1 %v63_v7  ;;  %264 = vset.pattern.permute.xlu0 %v326_v11  ;;  %56 = vst.msk [vmem:[#allocation3] sm:$0x1] %vm55_vm2, %v327_v12  ;;  %v248_v26 = vld [vmem:[%s394_s3] ss:$0 sm:$0xff]  ;;  %v175_v52 = vshrl.u32 %v174_v47, 7  ;;  %s328_s3 = smov [#allocation10]  }
  0x13   :  { %s236_s25 = sshll.u32 %s328_s3, 4  ;;  %s237_s25 = int_to_ptr.vmem [resolvable:$true] %s236_s25 }
  0x14   :  { %v176_v58 = vsub.s32 0, %v175_v52  ;;  %s299_s26 = scalar_lea.vmem %s237_s25, 16  ;;  %s303_s27 = scalar_lea.vmem %s237_s25, 32 }
  0x15   :  { %47 = vadd.xlane.f32.xlu0 %v46_v8  ;;  %p300_p5 = scmp.ne.s32.totalorder %s237_s25, %s299_s26  ;;  %p304_p6 = scmp.lt.s32.totalorder %s237_s25, %s237_s25 }
  0x16   :  { %p305_p7 = scmp.lt.s32.totalorder %s303_s27, %s299_s26 }
  0x17   :  { %v193_v37 = vld [vmem:[#allocation5] sm:$0x1]  ;;  %v168_v12 = vld [vmem:[#allocation4] sm:$0x1] }
  0x18   :  { %v203_v60 = vld [vmem:[#allocation6] sm:$0x1]  ;;  %p306_p8 = por %p305_p7, %p304_p6 }
  0x19   :  { %v158_v56 = vld [vmem:[#allocation3] sm:$0x1] }
  0x1a   :  { %p307_p9 = pnand %p306_p8, %p300_p5 }
  0x23   :  { %149 = vperm.xlu1 %263, %v146_v10  }
  0x9a   :  { %v39_v13 = vpop.xlane.xlu0 %38 }
  0x9b   :  { %v40_v14 = vmax.f32 %v39_v13, 1e-24  ;;  %v65_v17 = vpop.xlane.xlu1 %64 }
  0x9c   :  { %v66_v18 = vmax.f32 %v65_v17, 1e-24 }
  0x9d   :  { %265 = vrsqrt.f32 %v40_v14 }
  0x9e   :  { %v48_v15 = vpop.xlane.xlu0 %47 }
  0x9f   :  { %v49_v16 = vmax.f32 %v48_v15, 1e-24  ;;  %v150_v29 = vpop.permute.xlu1 %149 }
  0xa0   :  { %vm155_vm4 = vcmp.eq.s32.totalorder %v150_v29, %v248_v26 }
  0xa1   :  { %267 = vrsqrt.f32 %v49_v16  ;;  %v249_v30 = vsel %vm155_vm4, 1.0, %v324_v9 }
  0xa2   :  { %269 = vrsqrt.f32 %v66_v18  ;;  %v194_v31 = vsel %vm159_vm5, %v249_v30, 0.0 }
  0xa3   :  { %v195_v32 = vrot.slane %v194_v31, 4 }
  0xa5   :  { %v196_v33 = vadd.f32 %v195_v32, %v194_v31 }
  0xa7   :  { %v197_v34 = vrot.slane %v196_v33, 2 }
  0xa9   :  { %v198_v35 = vadd.f32 %v197_v34, %v196_v33 }
  0xaa   :  { %v266_v19 = vpop.eup %265 }
  0xab   :  { %v42_v21 = vmul.f32 %v266_v19, %v34_v0  ;;  %v199_v36 = vrot.slane %v198_v35, 1 }
  0xad   :  { %v200_v38 = vadd.f32 %v199_v36, %v198_v35 }
  0xae   :  { %v268_v20 = vpop.eup %267 }
  0xaf   :  { %v51_v22 = vmul.f32 %v268_v20, %v245_v1  ;;  %v270_v25 = vpop.eup %269  ;;  %v201_v39 = vadd.f32 %v200_v38, %v193_v37 }
  0xb0   :  { %v68_v28 = vmul.f32 %v270_v25, %v60_v4 }
  0xb1   :  { %v52_v23 = vadd.f32 %v51_v22, %v42_v21  ;;  %202 = vst.msk [vmem:[#allocation5] sm:$0x1] %vm55_vm2, %v201_v39 }
  0xb3   :  { %v53_v24 = vmul.f32 7.142857, %v52_v23 }
  0xb5   :  { %54 = vst.msk [vmem:[#allocation2] sm:$0xf] %vm36_vm0, %v53_v24 }
  0xb8   :  { %v223_v18 = vld [vmem:[#allocation5] sm:$0x1] }
  0xb9   :  { %v226_v19 = vadd.f32 1e-06, %v223_v18 }
  0xbc   :  { %v69_v27 = vld [vmem:[#allocation2] sm:$0xf] }
  0xbd   :  { %253 = vmatpush3.xpose.msk.msra.mxu0 %vm62_vm1, %v69_v27 }
  0xc0   :  { %255 = vmatmul.mubr.msk.f32.vlgmr.msra.gmra.mxu0 %vm62_vm1, %v68_v28 }
 0x180   :  { %v142_v40 = vpop.f32.mrf.mxu0 }
 0x181   :  { %v160_v41 = vsel %vm159_vm5, %v142_v40, -inf  ;;  %v204_v42 = vmul.f32 %v249_v30, %v142_v40 }
 0x182   :  { %v161_v43 = vrot.slane %v160_v41, 4  ;;  %v256_v44 = vpop.f32.mrf.mxu0 }
 0x183   :  { %v205_v45 = vsel %vm159_vm5, %v204_v42, 0.0 }
 0x184   :  { %v162_v46 = vmax.f32 %v160_v41, %v161_v43  ;;  %v206_v48 = vrot.slane %v205_v45, 4 }
 0x186   :  { %v163_v49 = vrot.slane %v162_v46, 2  ;;  %v207_v50 = vadd.f32 %v206_v48, %v205_v45 }
 0x188   :  { %v164_v51 = vmax.f32 %v162_v46, %v163_v49  ;;  %v208_v53 = vrot.slane %v207_v50, 2 }
 0x18a   :  { %v165_v54 = vrot.slane %v164_v51, 1  ;;  %v209_v55 = vadd.f32 %v208_v53, %v207_v50 }
 0x18c   :  { %v166_v57 = vmax.f32 %v164_v51, %v165_v54  ;;  %v210_v59 = vrot.slane %v209_v55, 1 }
 0x18e   :  { %v167_v61 = vmax.f32 %v158_v56, %v166_v57  ;;  %v211_v62 = vadd.f32 %v210_v59, %v209_v55 }
 0x190   :  { %v177_v63 = vrot.slane %v167_v61, %v176_v58  ;;  %192 = vst.msk [vmem:[#allocation3] sm:$0x1] %vm55_vm2, %v167_v61  ;;  %v212_v0 = vadd.f32 %v211_v62, %v203_v60  ;;  %v169_v3 = vsub.f32 %v158_v56, %v167_v61 }
 0x192   :  { %v179_v1 = vsub.f32 %v142_v40, %v177_v63  ;;  %213 = vst.msk [vmem:[#allocation6] sm:$0x1] %vm55_vm2, %v212_v0  ;;  %v170_v4 = vmul.f32 1.442695, %v169_v3 }
 0x194   :  { %v180_v2 = vmul.f32 1.442695, %v179_v1 }
 0x196   :  { %271 = vpow2.f32 %v180_v2 }
 0x197   :  { %273 = vpow2.f32 %v170_v4  ;;  %v217_v22 = vld [vmem:[#allocation3] sm:$0x1] }
 0x199   :  { %v222_v25 = vld [vmem:[#allocation6] sm:$0x1] }
 0x1a3   :  { %v272_v5 = vpop.eup %271 }
 0x1a4   :  { %v182_v6 = vsel %vm159_vm5, %v272_v5, 0.0  ;;  %v274_v11 = vpop.eup %273 }
 0x1a5   :  { %v183_v7 = vrot.slane %v182_v6, 4  ;;  %v172_v14 = vmul.f32 %v274_v11, %v168_v12 }
 0x1a7   :  { %v184_v8 = vadd.f32 %v183_v7, %v182_v6 }
 0x1a9   :  { %v185_v9 = vrot.slane %v184_v8, 2 }
 0x1ab   :  { %v186_v10 = vadd.f32 %v185_v9, %v184_v8 }
 0x1ad   :  { %v187_v13 = vrot.slane %v186_v10, 1 }
 0x1af   :  { %v188_v15 = vadd.f32 %v187_v13, %v186_v10 }
 0x1b1   :  { %v189_v16 = vadd.f32 %v188_v15, %v172_v14 }
 0x1b3   :  { %191 = vst.msk [vmem:[#allocation4] sm:$0x1] %vm55_vm2, %v189_v16 }
 0x1ba   :  { %v218_v17 = vld [vmem:[#allocation4] sm:$0x1] }
 0x1bb   :  { %275 = vlog2.f32 %v218_v17 }
 0x1bc   :  { %277 = vrcp.f32 %v226_v19 }
 0x1c8   :  { %v276_v20 = vpop.eup %275 }
 0x1c9   :  { %v220_v21 = vmul.f32 0.6931472, %v276_v20  ;;  %v278_v27 = vpop.eup %277 }
 0x1cb   :  { %v221_v23 = vadd.f32 %v220_v21, %v217_v22 }
 0x1cd   :  { %v224_v24 = vmul.f32 %v223_v18, %v221_v23 }
 0x1cf   :  { %v225_v26 = vsub.f32 %v222_v25, %v224_v24 }
 0x1d1   :  { %v228_v28 = vmul.f32 %v278_v27, %v225_v26 }
 0x1d3   :  { %229 = vst.msk [vmem:[#allocation10] sm:$0x1] %vm55_vm2, %v228_v28 }
 0x1d4   :  { %310 = shalt.err (!%p307_p9)
}
 0x1d5   :  { %239 = dma.vmem_to_hbm [thread:$0]  %s237_s25, 16, %s395_s4, [#allocation9]  }
 0x1d6   :  { %321 = dma.done.wait [#allocation9], 16  }
 0x1d7   :  { %322 = vsyncadd [#allocation9], 4294967280 }
 0x1d8   :  { %243 = vsyncpa [#allocation8], 1 }
 0x1d9   :  { %244 = vsyncpa [#allocation9], 1 }

</bundles_post_ra>
